<compile_context>
chip_gen: v7x
topology: tpu7x:2x2x1
jax: 0.10.0
libtpu: 0.0.40
codegen_flags: <defaults>
</compile_context>

<pallas_src>
import functools

import jax
import jax.numpy as jnp
from jax.experimental import pallas as pl
from jax.experimental.pallas import tpu as pltpu

BN_EPS = 1e-5


# ---------------------------------------------------------------------------
# Pallas kernels
# ---------------------------------------------------------------------------
def _conv_stats_kernel(a_ref, w_ref, stats_ref):
    # a_ref:     (tile_m, K)   im2col patch tile
    # w_ref:     (K, Coutp)    reshaped conv weight (resident across grid steps)
    # stats_ref: (1, 2, Coutp) per-tile [sum; sum-of-squares] partials
    y = jnp.dot(a_ref[...], w_ref[...], preferred_element_type=jnp.float32)
    s = jnp.sum(y, axis=0, keepdims=True)          # (1, Coutp)
    ss = jnp.sum(y * y, axis=0, keepdims=True)     # (1, Coutp)
    stats_ref[...] = jnp.concatenate([s, ss], axis=0)[None]


def _conv_apply_kernel(a_ref, w_ref, p_ref, o_ref):
    # a_ref: (tile_m, K), w_ref: (K, Coutp)
    # p_ref: (2, Coutp) -- row 0 = scale, row 1 = shift (fused BN affine)
    # o_ref: (tile_m, Coutp)
    y = jnp.dot(a_ref[...], w_ref[...], preferred_element_type=jnp.float32)
    out = y * p_ref[0:1, :] + p_ref[1:2, :]
    o_ref[...] = jnp.maximum(out, 0.0).astype(o_ref.dtype)


# ---------------------------------------------------------------------------
# Host-side glue
# ---------------------------------------------------------------------------
def _round_up(x, m):
    return (x + m - 1) // m * m


def _im2col(x, kernel, stride, padding):
    # x: (N, C, H, W) -> patches (M, K), K ordered (c, kh, kw) to match the
    # PyTorch weight layout (Cout, Cin, KH, KW).
    n, c, h, w = x.shape
    if padding > 0:
        x = jnp.pad(x, ((0, 0), (0, 0), (padding, padding), (padding, padding)))
        h, w = h + 2 * padding, w + 2 * padding
    oh = (h - kernel) // stride + 1
    ow = (w - kernel) // stride + 1
    cols = []
    for kh in range(kernel):
        for kw in range(kernel):
            cols.append(
                x[:, :, kh:kh + (oh - 1) * stride + 1:stride,
                        kw:kw + (ow - 1) * stride + 1:stride]
            )  # (N, C, OH, OW)
    patches = jnp.stack(cols, axis=2).reshape(n, c * kernel * kernel, oh, ow)
    patches = jnp.transpose(patches, (0, 2, 3, 1)).reshape(n * oh * ow, -1)
    return patches, oh, ow


@functools.partial(
    jax.jit,
    static_argnames=("kernel", "stride", "padding", "tile_m", "compute_dtype"))
def convbn_forward(x, weight, bias, gamma, beta, *, kernel=3, stride=1, padding=0,
                   tile_m=256, compute_dtype=jnp.float32):
    """Conv2d -> BatchNorm2d(training batch stats) -> ReLU.  NCHW in / NCHW out.

    `bias` is accepted for API parity but unused: training-mode BN subtracts the
    per-channel mean, so a per-channel additive bias cancels exactly.
    `tile_m`: 512-1024 is a good choice on v6e (128 MiB VMEM); keep roughly half
    that footprint on v7x (64 MiB VMEM).
    `compute_dtype`: set to jnp.bfloat16 for MXU-bound shapes (accumulation stays
    f32 via preferred_element_type); f32 here keeps the demo numerics tight.
    """
    del bias  # exact no-op under training-mode BatchNorm
    n, cin, _, _ = x.shape
    cout = weight.shape[0]
    k = cin * kernel * kernel

    a, oh, ow = _im2col(x, kernel, stride, padding)          # (M, K)
    m = a.shape[0]

    coutp = _round_up(cout, 128)          # lane-dense output channels
    mt = pl.cdiv(m, tile_m)
    mp = mt * tile_m

    a = a.astype(compute_dtype)
    if mp != m:
        # Zero rows contribute 0 to sum / sumsq (no bias), so dividing by the true
        # M below keeps the BN statistics exact; padded rows are sliced off later.
        a = jnp.pad(a, ((0, mp - m), (0, 0)))

    w_mat = weight.reshape(cout, k).T.astype(compute_dtype)  # (K, Cout)
    w_mat = jnp.pad(w_mat, ((0, 0), (0, coutp - cout)))      # zero-padded channels

    cparams = pltpu.CompilerParams(
        dimension_semantics=("parallel",),        # M tiles are independent
        vmem_limit_bytes=32 * 1024 * 1024,
    )

    # ---- Pass 1: per-tile per-channel sum / sum-of-squares of y = A @ W ----
    stats = pl.pallas_call(
        _conv_stats_kernel,
        out_shape=jax.ShapeDtypeStruct((mt, 2, coutp), jnp.float32),
        grid=(mt,),
        in_specs=[
            pl.BlockSpec((tile_m, k), lambda i: (i, 0)),
            pl.BlockSpec((k, coutp), lambda i: (0, 0)),      # resident weights
        ],
        out_specs=pl.BlockSpec((1, 2, coutp), lambda i: (i, 0, 0)),
        compiler_params=cparams,
    )(a, w_mat)

    # ---- Tiny host-side reduction + fused BN affine (Coutp-length vectors) ----
    sums = jnp.sum(stats[:, 0, :], axis=0)
    sumsq = jnp.sum(stats[:, 1, :], axis=0)
    mean = sums / m
    # One-pass variance; magnitudes are O(1) so f32 is fine, clamp guards rounding.
    var = jnp.maximum(sumsq / m - mean * mean, 0.0)
    inv_std = jax.lax.rsqrt(var + BN_EPS)
    gamma_p = jnp.pad(gamma.astype(jnp.float32), (0, coutp - cout))
    beta_p = jnp.pad(beta.astype(jnp.float32), (0, coutp - cout))
    scale = gamma_p * inv_std
    shift = beta_p - mean * scale
    params = jnp.stack([scale, shift], axis=0)               # (2, Coutp), one DMA

    # ---- Pass 2: recompute y per tile, apply fused scale/shift + ReLU ----
    out_flat = pl.pallas_call(
        _conv_apply_kernel,
        out_shape=jax.ShapeDtypeStruct((mp, coutp), jnp.float32),
        grid=(mt,),
        in_specs=[
            pl.BlockSpec((tile_m, k), lambda i: (i, 0)),
            pl.BlockSpec((k, coutp), lambda i: (0, 0)),
            pl.BlockSpec((2, coutp), lambda i: (0, 0)),
        ],
        out_specs=pl.BlockSpec((tile_m, coutp), lambda i: (i, 0)),
        compiler_params=cparams,
    )(a, w_mat, params)

    # Single layout conversion at the module boundary: (M, Coutp) -> NCHW.
    out = out_flat[:m, :cout].reshape(n, oh, ow, cout)
    return jnp.transpose(out, (0, 3, 1, 2))


# ---------------------------------------------------------------------------
# Reference + self-test
# ---------------------------------------------------------------------------
def _reference(x, weight, bias, gamma, beta, *, stride=1, padding=0):
    y = jax.lax.conv_general_dilated(
        x, weight, window_strides=(stride, stride),
        padding=[(padding, padding), (padding, padding)],
        dimension_numbers=("NCHW", "OIHW", "NCHW"),
    ) + bias.reshape(1, -1, 1, 1)
    mean = jnp.mean(y, axis=(0, 2, 3), keepdims=True)
    var = jnp.mean((y - mean) ** 2, axis=(0, 2, 3), keepdims=True)
    y_hat = (y - mean) * jax.lax.rsqrt(var + BN_EPS)
    out = gamma.reshape(1, -1, 1, 1) * y_hat + beta.reshape(1, -1, 1, 1)
    return jnp.maximum(out, 0.0)


if __name__ == "__main__":
    # Shapes consistent with ConvBN(in_chan=4, out_chan=8, kernel=3, stride=1, padding=0)
    N, CIN, COUT, H, W, KS = 2, 4, 8, 16, 16, 3

    key = jax.random.PRNGKey(0)
    kx, kw, kb = jax.random.split(key, 3)

    x = jax.random.normal(kx, (N, CIN, H, W), dtype=jnp.float32)
    weight = jax.random.normal(kw, (COUT, CIN, KS, KS), dtype=jnp.float32) * 0.1
    bias = jax.random.normal(kb, (COUT,), dtype=jnp.float32) * 0.1
    gamma = jnp.ones((COUT,), dtype=jnp.float32)   # BatchNorm2d.weight init
    beta = jnp.zeros((COUT,), dtype=jnp.float32)   # BatchNorm2d.bias init

    out = convbn_forward(x, weight, bias, gamma, beta, kernel=KS, stride=1, padding=0)
    out = jax.block_until_ready(out)

    ref = _reference(x, weight, bias, gamma, beta, stride=1, padding=0)
    assert out.shape == (N, COUT, H - KS + 1, W - KS + 1), out.shape
    err = float(jnp.max(jnp.abs(out - ref)))
    assert jnp.allclose(out, ref, atol=2e-4, rtol=2e-4), err

    print("KERNEL_OK")
</pallas_src>

<mosaic_0001>
module attributes {stable_mosaic.version = 11 : i64} {
  func.func @_conv_stats_kernel(%arg0: i32, %arg1: memref<256x36xf32, #tpu.memory_space<vmem>>, %arg2: memref<36x128xf32, #tpu.memory_space<vmem>>, %arg3: memref<1x2x128xf32, #tpu.memory_space<vmem>>) attributes {dimension_semantics = [#tpu.dimension_semantics<parallel>], iteration_bounds = array<i64: 2>, scalar_prefetch = 0 : i64, scratch_operands = 0 : i64, tpu.core_type = #tpu.core_type<tc>, window_params = [{transform_indices = @transform_0, window_bounds = array<i64: 256, 36>}, {pipeline_mode = #tpu.pipeline_mode<synchronous>, transform_indices = @transform_1, window_bounds = array<i64: 36, 128>}, {transform_indices = @transform_2, window_bounds = array<i64: 1, 2, 128>}]} {
    %c0 = arith.constant 0 : index
    %c0_0 = arith.constant 0 : index
    %0 = vector.load %arg1[%c0, %c0_0] : memref<256x36xf32, #tpu.memory_space<vmem>>, vector<256x36xf32>
    %c0_1 = arith.constant 0 : index
    %c0_2 = arith.constant 0 : index
    %1 = vector.load %arg2[%c0_1, %c0_2] : memref<36x128xf32, #tpu.memory_space<vmem>>, vector<36x128xf32>
    %cst = arith.constant dense<0.000000e+00> : vector<256x128xf32>
    %2 = tpu.matmul %0, %1, %cst {dimension_numbers = #tpu.dot_dimension_numbers<[1], [0], [0], [1], [0, 0, 1, 1], [], []>} : vector<256x36xf32>, vector<36x128xf32>, vector<256x128xf32> -> vector<256x128xf32>
    %cst_3 = arith.constant dense<0.000000e+00> : vector<128xf32>
    %3 = vector.multi_reduction <add>, %2, %cst_3 [0] : vector<256x128xf32> to vector<128xf32>
    %4 = vector.shape_cast %3 : vector<128xf32> to vector<1x128xf32>
    %5 = arith.mulf %2, %2 : vector<256x128xf32>
    %cst_4 = arith.constant dense<0.000000e+00> : vector<128xf32>
    %6 = vector.multi_reduction <add>, %5, %cst_4 [0] : vector<256x128xf32> to vector<128xf32>
    %7 = vector.shape_cast %6 : vector<128xf32> to vector<1x128xf32>
    %8 = tpu.concatenate %4, %7 in 0 : vector<1x128xf32>, vector<1x128xf32> -> vector<2x128xf32>
    %9 = vector.shape_cast %8 : vector<2x128xf32> to vector<1x2x128xf32>
    %c0_5 = arith.constant 0 : index
    %c0_6 = arith.constant 0 : index
    %c0_7 = arith.constant 0 : index
    %10 = vector.load %arg3[%c0_5, %c0_6, %c0_7] : memref<1x2x128xf32, #tpu.memory_space<vmem>>, vector<1x2x128xf32>
    tpu.vector_store %arg3[%c0_5, %c0_6, %c0_7], %9 {strides = array<i32>} : memref<1x2x128xf32, #tpu.memory_space<vmem>>, vector<1x2x128xf32>,
    return
  }
  func.func @transform_0(%arg0: i32) -> (i32, i32) {
    %c0_i32 = arith.constant 0 : i32
    %c0_i32_0 = arith.constant 0 : i32
    return %arg0, %c0_i32 : i32, i32
  }
  func.func @transform_1(%arg0: i32) -> (i32, i32) {
    %c0_i32 = arith.constant 0 : i32
    %c0_i32_0 = arith.constant 0 : i32
    %c0_i32_1 = arith.constant 0 : i32
    return %c0_i32, %c0_i32_0 : i32, i32
  }
  func.func @transform_2(%arg0: i32) -> (i32, i32, i32) {
    %c0_i32 = arith.constant 0 : i32
    %c0_i32_0 = arith.constant 0 : i32
    %c0_i32_1 = arith.constant 0 : i32
    return %arg0, %c0_i32, %c0_i32_0 : i32, i32, i32
  }
}

module attributes {stable_mosaic.version = 11 : i64} {
  func.func @_conv_apply_kernel(%arg0: i32, %arg1: memref<256x36xf32, #tpu.memory_space<vmem>>, %arg2: memref<36x128xf32, #tpu.memory_space<vmem>>, %arg3: memref<2x128xf32, #tpu.memory_space<vmem>>, %arg4: memref<256x128xf32, #tpu.memory_space<vmem>>) attributes {dimension_semantics = [#tpu.dimension_semantics<parallel>], iteration_bounds = array<i64: 2>, scalar_prefetch = 0 : i64, scratch_operands = 0 : i64, tpu.core_type = #tpu.core_type<tc>, window_params = [{transform_indices = @transform_0, window_bounds = array<i64: 256, 36>}, {pipeline_mode = #tpu.pipeline_mode<synchronous>, transform_indices = @transform_1, window_bounds = array<i64: 36, 128>}, {pipeline_mode = #tpu.pipeline_mode<synchronous>, transform_indices = @transform_2, window_bounds = array<i64: 2, 128>}, {transform_indices = @transform_3, window_bounds = array<i64: 256, 128>}]} {
    %c0 = arith.constant 0 : index
    %c0_0 = arith.constant 0 : index
    %0 = vector.load %arg1[%c0, %c0_0] : memref<256x36xf32, #tpu.memory_space<vmem>>, vector<256x36xf32>
    %c0_1 = arith.constant 0 : index
    %c0_2 = arith.constant 0 : index
    %1 = vector.load %arg2[%c0_1, %c0_2] : memref<36x128xf32, #tpu.memory_space<vmem>>, vector<36x128xf32>
    %cst = arith.constant dense<0.000000e+00> : vector<256x128xf32>
    %2 = tpu.matmul %0, %1, %cst {dimension_numbers = #tpu.dot_dimension_numbers<[1], [0], [0], [1], [0, 0, 1, 1], [], []>} : vector<256x36xf32>, vector<36x128xf32>, vector<256x128xf32> -> vector<256x128xf32>
    %c0_3 = arith.constant 0 : index
    %c0_4 = arith.constant 0 : index
    %3 = vector.load %arg3[%c0_3, %c0_4] : memref<2x128xf32, #tpu.memory_space<vmem>>, vector<1x128xf32>
    %4 = vector.broadcast %3 : vector<1x128xf32> to vector<256x128xf32>
    %5 = arith.mulf %2, %4 : vector<256x128xf32>
    %c1 = arith.constant 1 : index
    %c0_5 = arith.constant 0 : index
    %6 = vector.load %arg3[%c1, %c0_5] : memref<2x128xf32, #tpu.memory_space<vmem>>, vector<1x128xf32>
    %7 = vector.broadcast %6 : vector<1x128xf32> to vector<256x128xf32>
    %8 = arith.addf %5, %7 : vector<256x128xf32>
    %cst_6 = arith.constant 0.000000e+00 : f32
    %9 = vector.broadcast %cst_6 : f32 to vector<256x128xf32>
    %10 = arith.maximumf %8, %9 : vector<256x128xf32>
    %c0_7 = arith.constant 0 : index
    %c0_8 = arith.constant 0 : index
    %11 = vector.load %arg4[%c0_7, %c0_8] : memref<256x128xf32, #tpu.memory_space<vmem>>, vector<256x128xf32>
    tpu.vector_store %arg4[%c0_7, %c0_8], %10 {strides = array<i32>} : memref<256x128xf32, #tpu.memory_space<vmem>>, vector<256x128xf32>,
    return
  }
  func.func @transform_0(%arg0: i32) -> (i32, i32) {
    %c0_i32 = arith.constant 0 : i32
    %c0_i32_0 = arith.constant 0 : i32
    return %arg0, %c0_i32 : i32, i32
  }
  func.func @transform_1(%arg0: i32) -> (i32, i32) {
    %c0_i32 = arith.constant 0 : i32
    %c0_i32_0 = arith.constant 0 : i32
    %c0_i32_1 = arith.constant 0 : i32
    return %c0_i32, %c0_i32_0 : i32, i32
  }
  func.func @transform_2(%arg0: i32) -> (i32, i32) {
    %c0_i32 = arith.constant 0 : i32
    %c0_i32_0 = arith.constant 0 : i32
    %c0_i32_1 = arith.constant 0 : i32
    return %c0_i32, %c0_i32_0 : i32, i32
  }
  func.func @transform_3(%arg0: i32) -> (i32, i32) {
    %c0_i32 = arith.constant 0 : i32
    %c0_i32_0 = arith.constant 0 : i32
    return %arg0, %c0_i32 : i32, i32
  }
}

</mosaic_0001>

<bundles_post_ra>
// kernel: convbn_forward.3
= control target key start
LH: loop header
LB: loop body
LE: loop exit
PB: predicated region body
PF: predicated region fallthrough
CT: control target
= control target key end

     0   :  { %s922_s12 = smov 0   ;;  %s1139_s0 = inlined_call_operand.vmem [shape: f32[512,36], index: 0, kind: input, shape index: {}]   ;;  %s1140_s1 = inlined_call_operand.vmem [shape: f32[36,128], index: 1, kind: input, shape index: {}]   ;;  %s1141_s2 = inlined_call_operand.vmem [shape: f32[2,128], index: 2, kind: input, shape index: {}]   ;;  %s1142_s3 = inlined_call_operand.vmem [shape: f32[512,128], index: 3, kind: output, shape index: {}]  }
   0x1 LB: > { %s731_s13 = sadd.s32 4294967295, %s900_s12   ;;  %p735_p0 = scmp.ge.s32.totalorder %s900_s12, 1  ;;  %s900_s12 = sphi %s922_s12, %s13_s12  }
   0x2   : > { %p138_p1 = scmp.lt.s32.totalorder %s900_s12, 3 }
   0x4   : > { %p139_p2 = pnand %p735_p0, %p138_p1 }
   0x5   : > { %v206_v0 = vld [vmem:[%s1140_s1] sm:$0xff] (!%p139_p2)  ;;  %v207_v1 = vld [vmem:[%s1140_s1 + $0x8] sm:$0xff] (!%p139_p2)  ;;  %v208_v2 = vld [vmem:[%s1140_s1 + $0x10] sm:$0xff] (!%p139_p2)  ;;  %s736_s20 = sshll.u32 (!%p139_p2), %s731_s13, 5  ;;  %vm308_vm0 = vcmask (!%p139_p2), 1043456   ;;  %vm211_vm1 = vcmask (!%p139_p2), 293888  }
   0x6   : > { %142 = sbr.rel (%p139_p2) target bundleno = 267 (0x10b), region = 32  ;;  %v872_v3 = vpack.c.bf16 (!%p139_p2), %v207_v1, %v206_v0  ;;  %v209_v4 = vld [vmem:[%s1140_s1 + $0x18] sm:$0xff] (!%p139_p2)  ;;  %p163_p3 = scmp.lt.s32.totalorder (!%p139_p2), %s736_s20, 63  ;;  %v210_v6 = vld [vmem:[%s1140_s1 + $0x20] sm:$0xf] (!%p139_p2) }
   0x7   : > { %v876_v5 = vpack.c.bf16 (!%p139_p2), %v209_v4, %v208_v2  ;;  %v1026_v39 = vld [vmem:[%s1141_s2] ss:$0 sm:$0xff] (!%p139_p2)  ;;  %v1031_v41 = vld [vmem:[%s1141_s2 + $0x1] ss:$0 sm:$0xff] (!%p139_p2) }
   0x8   : > { %873 = vmatprep.subr.bf16.mxu0 (!%p139_p2), %v872_v3  ;;  %880 = vmatprep.subr.bf16.mxu1 (!%p139_p2), %v872_v3 }
   0x9   : > { %875 = vmatpush3.bf16.msra.mxu0 (!%p139_p2), %v872_v3  ;;  %883 = vmatpush3.bf16.msra.mxu1 (!%p139_p2), %v872_v3 }
   0xa   : > { %877 = vmatprep.subr.bf16.mxu0 (!%p139_p2), %v876_v5  ;;  %881 = vmatprep.subr.bf16.mxu1 (!%p139_p2), %v876_v5 }
   0xd   : > { %s1144_s20 = smov (!%p163_p3, %s736_s20), 63  ;;  %879 = vmatpush3.bf16.msra.mxu0 %v876_v5  ;;  %884 = vmatpush3.bf16.msra.mxu1 %v876_v5 }
   0xe   : > { %s737_s23 = sshll.u32 %s1144_s20, 3  ;;  %822 = vmatprep.subr.msk.mxu0 %vm308_vm0, %v210_v6  ;;  %882 = vmatprep.subr.msk.mxu1 %vm308_vm0, %v210_v6 }
   0xf   : > { %s953_s28 = scalar_lea.vmem %s1139_s0, %s737_s23  ;;  %s1044_s8 = scalar_lea.vmem %s1142_s3, %s737_s23 }
  0x10   : > { %v174_v7 = vld [vmem:[%s953_s28] sm:$0xff]  ;;  %v175_v9 = vld [vmem:[%s953_s28 + $0x8] sm:$0xff]  ;;  %v176_v11 = vld [vmem:[%s953_s28 + $0x10] sm:$0xff] }
  0x11   : > { %v190_v8 = vld [vmem:[%s953_s28 + $0x80] sm:$0xff]  ;;  %824 = vmatprep.mubr.msk.f32.mxu0 %vm211_vm1, %v174_v7  ;;  %v191_v10 = vld [vmem:[%s953_s28 + $0x88] sm:$0xff]  ;;  %v192_v12 = vld [vmem:[%s953_s28 + $0x90] sm:$0xff]  ;;  %823 = vmatpush3.msk.msra.mxu0 %vm308_vm0, %v210_v6 }
  0x12   : > { %848 = vmatprep.mubr.msk.f32.mxu1 %vm211_vm1, %v190_v8  ;;  %885 = vmatpush3.msk.msra.mxu1 %vm308_vm0, %v210_v6  ;;  %v177_v13 = vld [vmem:[%s953_s28 + $0x18] sm:$0xff]  ;;  %v178_v15 = vld [vmem:[%s953_s28 + $0x20] sm:$0xff]  ;;  %v179_v17 = vld [vmem:[%s953_s28 + $0x28] sm:$0xff] }
  0x13   : > { %825 = vmatmul.mubr.msk.f32.vlgmr.msra.gmra.mrb[0].mxu0 %vm211_vm1, %v175_v9  ;;  %849 = vmatmul.mubr.msk.f32.vlgmr.msra.gmra.mrb[0].mxu1 %vm211_vm1, %v191_v10  ;;  %v193_v14 = vld [vmem:[%s953_s28 + $0x98] sm:$0xff]  ;;  %v194_v16 = vld [vmem:[%s953_s28 + $0xa0] sm:$0xff]  ;;  %v195_v18 = vld [vmem:[%s953_s28 + $0xa8] sm:$0xff] }
  0x14   : > { %827 = vmatprep.mubr.msk.f32.mxu0 %vm211_vm1, %v176_v11  ;;  %851 = vmatprep.mubr.msk.f32.mxu1 %vm211_vm1, %v192_v12  ;;  %v180_v19 = vld [vmem:[%s953_s28 + $0x30] sm:$0xff]  ;;  %v181_v21 = vld [vmem:[%s953_s28 + $0x38] sm:$0xff]  ;;  %v182_v23 = vld [vmem:[%s953_s28 + $0x40] sm:$0xff] }
  0x15   : > { %v196_v20 = vld [vmem:[%s953_s28 + $0xb0] sm:$0xff]  ;;  %v197_v22 = vld [vmem:[%s953_s28 + $0xb8] sm:$0xff]  ;;  %v198_v24 = vld [vmem:[%s953_s28 + $0xc0] sm:$0xff] }
  0x16   : > { %v183_v25 = vld [vmem:[%s953_s28 + $0x48] sm:$0xff]  ;;  %v184_v27 = vld [vmem:[%s953_s28 + $0x50] sm:$0xff]  ;;  %v185_v29 = vld [vmem:[%s953_s28 + $0x58] sm:$0xff] }
  0x17   : > { %828 = vmatmul.mubr.msk.f32.gmra.mrb[2].mxu0 %vm211_vm1, %v177_v13  ;;  %852 = vmatmul.mubr.msk.f32.gmra.mrb[2].mxu1 %vm211_vm1, %v193_v14  ;;  %v199_v26 = vld [vmem:[%s953_s28 + $0xc8] sm:$0xff]  ;;  %v200_v28 = vld [vmem:[%s953_s28 + $0xd0] sm:$0xff]  ;;  %v201_v30 = vld [vmem:[%s953_s28 + $0xd8] sm:$0xff] }
  0x18   : > { %830 = vmatprep.mubr.msk.f32.mxu0 %vm211_vm1, %v178_v15  ;;  %854 = vmatprep.mubr.msk.f32.mxu1 %vm211_vm1, %v194_v16  ;;  %v186_v31 = vld [vmem:[%s953_s28 + $0x60] sm:$0xff]  ;;  %v187_v33 = vld [vmem:[%s953_s28 + $0x68] sm:$0xff]  ;;  %v188_v35 = vld [vmem:[%s953_s28 + $0x70] sm:$0xff] }
  0x19   : > { %v202_v32 = vld [vmem:[%s953_s28 + $0xe0] sm:$0xff]  ;;  %v203_v34 = vld [vmem:[%s953_s28 + $0xe8] sm:$0xff]  ;;  %v204_v36 = vld [vmem:[%s953_s28 + $0xf0] sm:$0xff] }
  0x1a   : > { %v189_v37 = vld [vmem:[%s953_s28 + $0x78] sm:$0xff] }
  0x1b   : > { %831 = vmatmul.mubr.msk.f32.gmra.mrb[4].mxu0 %vm211_vm1, %v179_v17  ;;  %855 = vmatmul.mubr.msk.f32.gmra.mrb[4].mxu1 %vm211_vm1, %v195_v18  ;;  %v205_v38 = vld [vmem:[%s953_s28 + $0xf8] sm:$0xff] }
  0x1c   : > { %833 = vmatprep.mubr.msk.f32.mxu0 %vm211_vm1, %v180_v19  ;;  %857 = vmatprep.mubr.msk.f32.mxu1 %vm211_vm1, %v196_v20 }
  0x1f   : > { %834 = vmatmul.mubr.msk.f32.gmra.mrb[6].mxu0 %vm211_vm1, %v181_v21  ;;  %858 = vmatmul.mubr.msk.f32.gmra.mrb[6].mxu1 %vm211_vm1, %v197_v22 }
  0x20   : > { %836 = vmatprep.mubr.msk.f32.mxu0 %vm211_vm1, %v182_v23  ;;  %860 = vmatprep.mubr.msk.f32.mxu1 %vm211_vm1, %v198_v24 }
  0x23   : > { %837 = vmatmul.mubr.msk.f32.gmra.mrb[8].mxu0 %vm211_vm1, %v183_v25  ;;  %861 = vmatmul.mubr.msk.f32.gmra.mrb[8].mxu1 %vm211_vm1, %v199_v26 }
  0x24   : > { %839 = vmatprep.mubr.msk.f32.mxu0 %vm211_vm1, %v184_v27  ;;  %863 = vmatprep.mubr.msk.f32.mxu1 %vm211_vm1, %v200_v28 }
  0x27   : > { %840 = vmatmul.mubr.msk.f32.gmra.mrb[10].mxu0 %vm211_vm1, %v185_v29  ;;  %864 = vmatmul.mubr.msk.f32.gmra.mrb[10].mxu1 %vm211_vm1, %v201_v30 }
  0x28   : > { %842 = vmatprep.mubr.msk.f32.mxu0 %vm211_vm1, %v186_v31  ;;  %866 = vmatprep.mubr.msk.f32.mxu1 %vm211_vm1, %v202_v32 }
  0x2b   : > { %843 = vmatmul.mubr.msk.f32.gmra.mrb[12].mxu0 %vm211_vm1, %v187_v33  ;;  %867 = vmatmul.mubr.msk.f32.gmra.mrb[12].mxu1 %vm211_vm1, %v203_v34 }
  0x2c   : > { %845 = vmatprep.mubr.msk.f32.mxu0 %vm211_vm1, %v188_v35  ;;  %869 = vmatprep.mubr.msk.f32.mxu1 %vm211_vm1, %v204_v36 }
  0x2f   : > { %846 = vmatmul.mubr.msk.f32.gmra.mrb[14].mxu0 %vm211_vm1, %v189_v37  ;;  %870 = vmatmul.mubr.msk.f32.gmra.mrb[14].mxu1 %vm211_vm1, %v205_v38 }
  0xe6   : > { %v826_v40 = vpop.f32.mrb[0].mxu0  ;;  %v850_v42 = vpop.f32.mrb[0].mxu1 }
  0xe7   : > { %v543_v43 = vmul.f32 %v826_v40, %v1026_v39  ;;  %v559_v44 = vmul.f32 %v850_v42, %v1026_v39  ;;  %v378_v45 = vpop.f32.mrb[1].mxu0  ;;  %v458_v46 = vpop.f32.mrb[1].mxu1 }
  0xe8   : > { %v542_v47 = vmul.f32 %v1026_v39, %v378_v45  ;;  %v558_v48 = vmul.f32 %v1026_v39, %v458_v46 }
  0xe9   : > { %v580_v49 = vadd.f32 %v1031_v41, %v543_v43  ;;  %v596_v50 = vadd.f32 %v1031_v41, %v559_v44 }
  0xea   : > { %v579_v51 = vadd.f32 %v1031_v41, %v542_v47  ;;  %v595_v52 = vadd.f32 %v1031_v41, %v558_v48  ;;  %v829_v53 = vpop.f32.mrb[2].mxu0  ;;  %v853_v54 = vpop.f32.mrb[2].mxu1 }
  0xeb   : > { %v612_v55 = vmax.f32 %v580_v49, 0.0  ;;  %v628_v56 = vmax.f32 %v596_v50, 0.0  ;;  %v545_v57 = vmul.f32 %v829_v53, %v1026_v39  ;;  %v561_v58 = vmul.f32 %v853_v54, %v1026_v39  ;;  %v388_v59 = vpop.f32.mrb[3].mxu0  ;;  %v468_v60 = vpop.f32.mrb[3].mxu1 }
  0xec   : > { %v611_v61 = vmax.f32 %v579_v51, 0.0  ;;  %v627_v62 = vmax.f32 %v595_v52, 0.0  ;;  %v544_v63 = vmul.f32 %v1026_v39, %v388_v59  ;;  %v560_v0 = vmul.f32 %v1026_v39, %v468_v60 }
  0xed   : > { %644 = vst [vmem:[%s1044_s8 + $0x8] sm:$0xff] %v612_v55  ;;  %660 = vst [vmem:[%s1044_s8 + $0x88] sm:$0xff] %v628_v56  ;;  %v582_v1 = vadd.f32 %v1031_v41, %v545_v57  ;;  %v598_v2 = vadd.f32 %v1031_v41, %v561_v58 }
  0xee   : > { %643 = vst [vmem:[%s1044_s8] sm:$0xff] %v611_v61  ;;  %659 = vst [vmem:[%s1044_s8 + $0x80] sm:$0xff] %v627_v62  ;;  %v581_v3 = vadd.f32 %v1031_v41, %v544_v63  ;;  %v597_v4 = vadd.f32 %v1031_v41, %v560_v0  ;;  %v832_v5 = vpop.f32.mrb[4].mxu0  ;;  %v856_v6 = vpop.f32.mrb[4].mxu1 }
  0xef   : > { %v614_v7 = vmax.f32 %v582_v1, 0.0  ;;  %v630_v8 = vmax.f32 %v598_v2, 0.0  ;;  %v547_v9 = vmul.f32 %v832_v5, %v1026_v39  ;;  %v563_v10 = vmul.f32 %v856_v6, %v1026_v39  ;;  %v398_v11 = vpop.f32.mrb[5].mxu0  ;;  %v478_v12 = vpop.f32.mrb[5].mxu1 }
  0xf0   : > { %v613_v13 = vmax.f32 %v581_v3, 0.0  ;;  %v629_v14 = vmax.f32 %v597_v4, 0.0  ;;  %v546_v15 = vmul.f32 %v1026_v39, %v398_v11  ;;  %v562_v16 = vmul.f32 %v1026_v39, %v478_v12 }
  0xf1   : > { %646 = vst [vmem:[%s1044_s8 + $0x18] sm:$0xff] %v614_v7  ;;  %662 = vst [vmem:[%s1044_s8 + $0x98] sm:$0xff] %v630_v8  ;;  %v584_v17 = vadd.f32 %v1031_v41, %v547_v9  ;;  %v600_v18 = vadd.f32 %v1031_v41, %v563_v10 }
  0xf2   : > { %645 = vst [vmem:[%s1044_s8 + $0x10] sm:$0xff] %v613_v13  ;;  %661 = vst [vmem:[%s1044_s8 + $0x90] sm:$0xff] %v629_v14  ;;  %v583_v19 = vadd.f32 %v1031_v41, %v546_v15  ;;  %v599_v20 = vadd.f32 %v1031_v41, %v562_v16  ;;  %v835_v21 = vpop.f32.mrb[6].mxu0  ;;  %v859_v22 = vpop.f32.mrb[6].mxu1 }
  0xf3   : > { %v616_v23 = vmax.f32 %v584_v17, 0.0  ;;  %v632_v24 = vmax.f32 %v600_v18, 0.0  ;;  %v549_v25 = vmul.f32 %v835_v21, %v1026_v39  ;;  %v565_v26 = vmul.f32 %v859_v22, %v1026_v39  ;;  %v408_v27 = vpop.f32.mrb[7].mxu0  ;;  %v488_v28 = vpop.f32.mrb[7].mxu1 }
  0xf4   : > { %v615_v29 = vmax.f32 %v583_v19, 0.0  ;;  %v631_v30 = vmax.f32 %v599_v20, 0.0  ;;  %v548_v31 = vmul.f32 %v1026_v39, %v408_v27  ;;  %v564_v32 = vmul.f32 %v1026_v39, %v488_v28 }
  0xf5   : > { %648 = vst [vmem:[%s1044_s8 + $0x28] sm:$0xff] %v616_v23  ;;  %664 = vst [vmem:[%s1044_s8 + $0xa8] sm:$0xff] %v632_v24  ;;  %v586_v33 = vadd.f32 %v1031_v41, %v549_v25  ;;  %v602_v34 = vadd.f32 %v1031_v41, %v565_v26 }
  0xf6   : > { %647 = vst [vmem:[%s1044_s8 + $0x20] sm:$0xff] %v615_v29  ;;  %663 = vst [vmem:[%s1044_s8 + $0xa0] sm:$0xff] %v631_v30  ;;  %v585_v35 = vadd.f32 %v1031_v41, %v548_v31  ;;  %v601_v36 = vadd.f32 %v1031_v41, %v564_v32  ;;  %v838_v37 = vpop.f32.mrb[8].mxu0  ;;  %v862_v38 = vpop.f32.mrb[8].mxu1 }
  0xf7   : > { %v618_v40 = vmax.f32 %v586_v33, 0.0  ;;  %v634_v42 = vmax.f32 %v602_v34, 0.0  ;;  %v551_v43 = vmul.f32 %v838_v37, %v1026_v39  ;;  %v567_v44 = vmul.f32 %v862_v38, %v1026_v39  ;;  %v418_v45 = vpop.f32.mrb[9].mxu0  ;;  %v498_v46 = vpop.f32.mrb[9].mxu1 }
  0xf8   : > { %v617_v47 = vmax.f32 %v585_v35, 0.0  ;;  %v633_v48 = vmax.f32 %v601_v36, 0.0  ;;  %v550_v49 = vmul.f32 %v1026_v39, %v418_v45  ;;  %v566_v50 = vmul.f32 %v1026_v39, %v498_v46 }
  0xf9   : > { %650 = vst [vmem:[%s1044_s8 + $0x38] sm:$0xff] %v618_v40  ;;  %666 = vst [vmem:[%s1044_s8 + $0xb8] sm:$0xff] %v634_v42  ;;  %v588_v51 = vadd.f32 %v1031_v41, %v551_v43  ;;  %v604_v52 = vadd.f32 %v1031_v41, %v567_v44 }
  0xfa   : > { %649 = vst [vmem:[%s1044_s8 + $0x30] sm:$0xff] %v617_v47  ;;  %665 = vst [vmem:[%s1044_s8 + $0xb0] sm:$0xff] %v633_v48  ;;  %v587_v53 = vadd.f32 %v1031_v41, %v550_v49  ;;  %v603_v54 = vadd.f32 %v1031_v41, %v566_v50  ;;  %v841_v55 = vpop.f32.mrb[10].mxu0  ;;  %v865_v56 = vpop.f32.mrb[10].mxu1 }
  0xfb   : > { %v620_v57 = vmax.f32 %v588_v51, 0.0  ;;  %v636_v58 = vmax.f32 %v604_v52, 0.0  ;;  %v553_v59 = vmul.f32 %v841_v55, %v1026_v39  ;;  %v569_v60 = vmul.f32 %v865_v56, %v1026_v39  ;;  %v428_v61 = vpop.f32.mrb[11].mxu0  ;;  %v508_v62 = vpop.f32.mrb[11].mxu1 }
  0xfc   : > { %v619_v63 = vmax.f32 %v587_v53, 0.0  ;;  %v635_v0 = vmax.f32 %v603_v54, 0.0  ;;  %v552_v1 = vmul.f32 %v1026_v39, %v428_v61  ;;  %v568_v2 = vmul.f32 %v1026_v39, %v508_v62 }
  0xfd   : > { %652 = vst [vmem:[%s1044_s8 + $0x48] sm:$0xff] %v620_v57  ;;  %668 = vst [vmem:[%s1044_s8 + $0xc8] sm:$0xff] %v636_v58  ;;  %v590_v3 = vadd.f32 %v1031_v41, %v553_v59  ;;  %v606_v4 = vadd.f32 %v1031_v41, %v569_v60 }
  0xfe   : > { %651 = vst [vmem:[%s1044_s8 + $0x40] sm:$0xff] %v619_v63  ;;  %667 = vst [vmem:[%s1044_s8 + $0xc0] sm:$0xff] %v635_v0  ;;  %v589_v5 = vadd.f32 %v1031_v41, %v552_v1  ;;  %v605_v6 = vadd.f32 %v1031_v41, %v568_v2  ;;  %v844_v7 = vpop.f32.mrb[12].mxu0  ;;  %v868_v8 = vpop.f32.mrb[12].mxu1 }
  0xff   : > { %v622_v9 = vmax.f32 %v590_v3, 0.0  ;;  %v638_v10 = vmax.f32 %v606_v4, 0.0  ;;  %v555_v11 = vmul.f32 %v844_v7, %v1026_v39  ;;  %v571_v12 = vmul.f32 %v868_v8, %v1026_v39  ;;  %v438_v13 = vpop.f32.mrb[13].mxu0  ;;  %v518_v14 = vpop.f32.mrb[13].mxu1 }
 0x100   : > { %v621_v15 = vmax.f32 %v589_v5, 0.0  ;;  %v637_v16 = vmax.f32 %v605_v6, 0.0  ;;  %v554_v17 = vmul.f32 %v1026_v39, %v438_v13  ;;  %v570_v18 = vmul.f32 %v1026_v39, %v518_v14 }
 0x101   : > { %654 = vst [vmem:[%s1044_s8 + $0x58] sm:$0xff] %v622_v9  ;;  %670 = vst [vmem:[%s1044_s8 + $0xd8] sm:$0xff] %v638_v10  ;;  %v592_v19 = vadd.f32 %v1031_v41, %v555_v11  ;;  %v608_v20 = vadd.f32 %v1031_v41, %v571_v12 }
 0x102   : > { %653 = vst [vmem:[%s1044_s8 + $0x50] sm:$0xff] %v621_v15  ;;  %669 = vst [vmem:[%s1044_s8 + $0xd0] sm:$0xff] %v637_v16  ;;  %v591_v21 = vadd.f32 %v1031_v41, %v554_v17  ;;  %v607_v22 = vadd.f32 %v1031_v41, %v570_v18  ;;  %v847_v23 = vpop.f32.mrb[14].mxu0  ;;  %v871_v24 = vpop.f32.mrb[14].mxu1 }
 0x103   : > { %v624_v25 = vmax.f32 %v592_v19, 0.0  ;;  %v640_v26 = vmax.f32 %v608_v20, 0.0  ;;  %v557_v27 = vmul.f32 %v847_v23, %v1026_v39  ;;  %v573_v28 = vmul.f32 %v871_v24, %v1026_v39  ;;  %v448_v29 = vpop.f32.mrb[15].mxu0  ;;  %v528_v30 = vpop.f32.mrb[15].mxu1 }
 0x104   : > { %v623_v31 = vmax.f32 %v591_v21, 0.0  ;;  %v639_v32 = vmax.f32 %v607_v22, 0.0  ;;  %v556_v33 = vmul.f32 %v1026_v39, %v448_v29  ;;  %v572_v34 = vmul.f32 %v1026_v39, %v528_v30 }
 0x105   : > { %656 = vst [vmem:[%s1044_s8 + $0x68] sm:$0xff] %v624_v25  ;;  %672 = vst [vmem:[%s1044_s8 + $0xe8] sm:$0xff] %v640_v26  ;;  %v594_v35 = vadd.f32 %v1031_v41, %v557_v27  ;;  %v610_v36 = vadd.f32 %v1031_v41, %v573_v28 }
 0x106   : > { %655 = vst [vmem:[%s1044_s8 + $0x60] sm:$0xff] %v623_v31  ;;  %671 = vst [vmem:[%s1044_s8 + $0xe0] sm:$0xff] %v639_v32  ;;  %v593_v37 = vadd.f32 %v1031_v41, %v556_v33  ;;  %v609_v38 = vadd.f32 %v1031_v41, %v572_v34 }
 0x107   : > { %v626_v40 = vmax.f32 %v594_v35, 0.0  ;;  %v642_v42 = vmax.f32 %v610_v36, 0.0 }
 0x108   : > { %v625_v43 = vmax.f32 %v593_v37, 0.0  ;;  %v641_v44 = vmax.f32 %v609_v38, 0.0 }
 0x109   : > { %658 = vst [vmem:[%s1044_s8 + $0x78] sm:$0xff] %v626_v40  ;;  %674 = vst [vmem:[%s1044_s8 + $0xf8] sm:$0xff] %v642_v42 }
 0x10a   : > { %657 = vst [vmem:[%s1044_s8 + $0x70] sm:$0xff] %v625_v43  ;;  %673 = vst [vmem:[%s1044_s8 + $0xf0] sm:$0xff] %v641_v44 }
 0x10b PF: > { %s13_s12 = sadd.s32 1, %s900_s12  }
 0x10c   : > { %p10_p4 = scmp.ge.s32.totalorder %s13_s12, 4  }
 0x10e   :  { %12 = sbr.rel (!%p10_p4) target bundleno = 1 (0x1), region = 62 }

// kernel: convbn_forward.2
= control target key start
LH: loop header
LB: loop body
LE: loop exit
PB: predicated region body
PF: predicated region fallthrough
CT: control target
= control target key end

     0   :  { %s852_s9 = smov 0   ;;  %s1000_s0 = inlined_call_operand.vmem [shape: f32[512,36], index: 0, kind: input, shape index: {}]   ;;  %s1001_s1 = inlined_call_operand.vmem [shape: f32[36,128], index: 1, kind: input, shape index: {}]   ;;  %s1002_s2 = inlined_call_operand.vmem [shape: f32[2,2,128], index: 2, kind: output, shape index: {}]  }
   0x1 LB: > { %s858_s10 = sadd.s32 4294967295, %s835_s9   ;;  %p673_p0 = scmp.ge.s32.totalorder %s835_s9, 1  ;;  %s835_s9 = sphi %s852_s9, %s12_s9  }
   0x2   : > { %p113_p1 = scmp.lt.s32.totalorder %s835_s9, 3 }
   0x4   : > { %p114_p2 = pnand %p673_p0, %p113_p1 }
   0x5   : > { %v176_v0 = vld [vmem:[%s1001_s1] sm:$0xff] (!%p114_p2)  ;;  %v177_v1 = vld [vmem:[%s1001_s1 + $0x8] sm:$0xff] (!%p114_p2)  ;;  %v178_v2 = vld [vmem:[%s1001_s1 + $0x10] sm:$0xff] (!%p114_p2)  ;;  %s674_s17 = sshll.u32 (!%p114_p2), %s858_s10, 5  ;;  %vm181_vm0 = vcmask (!%p114_p2), 293888   ;;  %vm278_vm1 = vcmask (!%p114_p2), 1043456  }
   0x6   : > { %117 = sbr.rel (%p114_p2) target bundleno = 311 (0x137), region = 28  ;;  %v807_v3 = vpack.c.bf16 (!%p114_p2), %v177_v1, %v176_v0  ;;  %v179_v4 = vld [vmem:[%s1001_s1 + $0x18] sm:$0xff] (!%p114_p2)  ;;  %p135_p3 = scmp.lt.s32.totalorder (!%p114_p2), %s674_s17, 63  ;;  %v180_v6 = vld [vmem:[%s1001_s1 + $0x20] sm:$0xf] (!%p114_p2)  ;;  %vm613_vm2 = vcmask (!%p114_p2), 1040384  }
   0x7   : > { %v811_v5 = vpack.c.bf16 (!%p114_p2), %v179_v4, %v178_v2  ;;  %p140_p4 = scmp.lt.s32.totalorder (!%p114_p2), %s858_s10, 1 }
   0x8   : > { %808 = vmatprep.subr.bf16.mxu0 (!%p114_p2), %v807_v3  ;;  %815 = vmatprep.subr.bf16.mxu1 (!%p114_p2), %v807_v3 }
   0x9   : > { %810 = vmatpush3.bf16.msra.mxu0 (!%p114_p2), %v807_v3  ;;  %818 = vmatpush3.bf16.msra.mxu1 (!%p114_p2), %v807_v3 }
   0xa   : > { %812 = vmatprep.subr.bf16.mxu0 (!%p114_p2), %v811_v5  ;;  %816 = vmatprep.subr.bf16.mxu1 (!%p114_p2), %v811_v5 }
   0xd   : > { %s1004_s17 = smov (!%p135_p3, %s674_s17), 63  ;;  %814 = vmatpush3.bf16.msra.mxu0 %v811_v5  ;;  %819 = vmatpush3.bf16.msra.mxu1 %v811_v5  ;;  %s1006_s10 = smov (!%p140_p4, %s858_s10), 1 }
   0xe   : > { %s675_s20 = sshll.u32 %s1004_s17, 3  ;;  %757 = vmatprep.subr.msk.mxu0 %vm278_vm1, %v180_v6  ;;  %817 = vmatprep.subr.msk.mxu1 %vm278_vm1, %v180_v6  ;;  %s676_s26 = sshll.u32 %s1006_s10, 1 }
   0xf   : > { %s881_s25 = scalar_lea.vmem %s1000_s0, %s675_s20  ;;  %s143_s29 = scalar_lea.vmem %s1002_s2, %s676_s26 }
  0x10   : > { %v144_v7 = vld [vmem:[%s881_s25] sm:$0xff]  ;;  %v145_v8 = vld [vmem:[%s881_s25 + $0x8] sm:$0xff]  ;;  %v146_v9 = vld [vmem:[%s881_s25 + $0x10] sm:$0xff] }
  0x11   : > { %759 = vmatprep.mubr.msk.f32.mxu0 %vm181_vm0, %v144_v7  ;;  %758 = vmatpush3.msk.msra.mxu0 %vm278_vm1, %v180_v6  ;;  %v160_v10 = vld [vmem:[%s881_s25 + $0x80] sm:$0xff]  ;;  %v161_v11 = vld [vmem:[%s881_s25 + $0x88] sm:$0xff]  ;;  %v162_v12 = vld [vmem:[%s881_s25 + $0x90] sm:$0xff] }
  0x12   : > { %760 = vmatmul.mubr.msk.f32.vlgmr.msra.gmra.mrb[0].mxu0 %vm181_vm0, %v145_v8  ;;  %820 = vmatpush3.msk.msra.mxu1 %vm278_vm1, %v180_v6  ;;  %v147_v13 = vld [vmem:[%s881_s25 + $0x18] sm:$0xff]  ;;  %v148_v14 = vld [vmem:[%s881_s25 + $0x20] sm:$0xff]  ;;  %v149_v17 = vld [vmem:[%s881_s25 + $0x28] sm:$0xff] }
  0x13   : > { %762 = vmatprep.mubr.msk.f32.mxu0 %vm181_vm0, %v146_v9  ;;  %783 = vmatprep.mubr.msk.f32.mxu1 %vm181_vm0, %v160_v10  ;;  %v163_v15 = vld [vmem:[%s881_s25 + $0x98] sm:$0xff]  ;;  %v164_v16 = vld [vmem:[%s881_s25 + $0xa0] sm:$0xff]  ;;  %v150_v18 = vld [vmem:[%s881_s25 + $0x30] sm:$0xff] }
  0x14   : > { %784 = vmatmul.mubr.msk.f32.vlgmr.msra.gmra.mrb[0].mxu1 %vm181_vm0, %v161_v11  ;;  %v165_v19 = vld [vmem:[%s881_s25 + $0xa8] sm:$0xff]  ;;  %v166_v20 = vld [vmem:[%s881_s25 + $0xb0] sm:$0xff]  ;;  %v151_v21 = vld [vmem:[%s881_s25 + $0x38] sm:$0xff] }
  0x15   : > { %786 = vmatprep.mubr.msk.f32.mxu1 %vm181_vm0, %v162_v12  ;;  %v152_v22 = vld [vmem:[%s881_s25 + $0x40] sm:$0xff]  ;;  %v167_v23 = vld [vmem:[%s881_s25 + $0xb8] sm:$0xff]  ;;  %v153_v25 = vld [vmem:[%s881_s25 + $0x48] sm:$0xff] }
  0x16   : > { %763 = vmatmul.mubr.msk.f32.gmra.mrb[2].mxu0 %vm181_vm0, %v147_v13  ;;  %v168_v24 = vld [vmem:[%s881_s25 + $0xc0] sm:$0xff]  ;;  %v154_v26 = vld [vmem:[%s881_s25 + $0x50] sm:$0xff]  ;;  %v169_v27 = vld [vmem:[%s881_s25 + $0xc8] sm:$0xff] }
  0x17   : > { %765 = vmatprep.mubr.msk.f32.mxu0 %vm181_vm0, %v148_v14  ;;  %v170_v28 = vld [vmem:[%s881_s25 + $0xd0] sm:$0xff]  ;;  %v155_v29 = vld [vmem:[%s881_s25 + $0x58] sm:$0xff]  ;;  %v156_v30 = vld [vmem:[%s881_s25 + $0x60] sm:$0xff] }
  0x18   : > { %787 = vmatmul.mubr.msk.f32.gmra.mrb[2].mxu1 %vm181_vm0, %v163_v15  ;;  %v171_v31 = vld [vmem:[%s881_s25 + $0xd8] sm:$0xff]  ;;  %v172_v32 = vld [vmem:[%s881_s25 + $0xe0] sm:$0xff]  ;;  %v157_v33 = vld [vmem:[%s881_s25 + $0x68] sm:$0xff] }
  0x19   : > { %789 = vmatprep.mubr.msk.f32.mxu1 %vm181_vm0, %v164_v16  ;;  %v158_v34 = vld [vmem:[%s881_s25 + $0x70] sm:$0xff]  ;;  %v173_v35 = vld [vmem:[%s881_s25 + $0xe8] sm:$0xff]  ;;  %v159_v37 = vld [vmem:[%s881_s25 + $0x78] sm:$0xff] }
  0x1a   : > { %766 = vmatmul.mubr.msk.f32.gmra.mrb[4].mxu0 %vm181_vm0, %v149_v17  ;;  %v174_v36 = vld [vmem:[%s881_s25 + $0xf0] sm:$0xff]  ;;  %v175_v38 = vld [vmem:[%s881_s25 + $0xf8] sm:$0xff] }
  0x1b   : > { %768 = vmatprep.mubr.msk.f32.mxu0 %vm181_vm0, %v150_v18 }
  0x1c   : > { %790 = vmatmul.mubr.msk.f32.gmra.mrb[4].mxu1 %vm181_vm0, %v165_v19 }
  0x1d   : > { %792 = vmatprep.mubr.msk.f32.mxu1 %vm181_vm0, %v166_v20 }
  0x1e   : > { %769 = vmatmul.mubr.msk.f32.gmra.mrb[6].mxu0 %vm181_vm0, %v151_v21 }
  0x1f   : > { %771 = vmatprep.mubr.msk.f32.mxu0 %vm181_vm0, %v152_v22 }
  0x20   : > { %793 = vmatmul.mubr.msk.f32.gmra.mrb[6].mxu1 %vm181_vm0, %v167_v23 }
  0x21   : > { %795 = vmatprep.mubr.msk.f32.mxu1 %vm181_vm0, %v168_v24 }
  0x22   : > { %772 = vmatmul.mubr.msk.f32.gmra.mrb[8].mxu0 %vm181_vm0, %v153_v25 }
  0x23   : > { %774 = vmatprep.mubr.msk.f32.mxu0 %vm181_vm0, %v154_v26 }
  0x24   : > { %796 = vmatmul.mubr.msk.f32.gmra.mrb[8].mxu1 %vm181_vm0, %v169_v27 }
  0x25   : > { %798 = vmatprep.mubr.msk.f32.mxu1 %vm181_vm0, %v170_v28 }
  0x26   : > { %775 = vmatmul.mubr.msk.f32.gmra.mrb[10].mxu0 %vm181_vm0, %v155_v29 }
  0x27   : > { %777 = vmatprep.mubr.msk.f32.mxu0 %vm181_vm0, %v156_v30 }
  0x28   : > { %799 = vmatmul.mubr.msk.f32.gmra.mrb[10].mxu1 %vm181_vm0, %v171_v31 }
  0x29   : > { %801 = vmatprep.mubr.msk.f32.mxu1 %vm181_vm0, %v172_v32 }
  0x2a   : > { %778 = vmatmul.mubr.msk.f32.gmra.mrb[12].mxu0 %vm181_vm0, %v157_v33 }
  0x2b   : > { %780 = vmatprep.mubr.msk.f32.mxu0 %vm181_vm0, %v158_v34 }
  0x2c   : > { %802 = vmatmul.mubr.msk.f32.gmra.mrb[12].mxu1 %vm181_vm0, %v173_v35 }
  0x2d   : > { %804 = vmatprep.mubr.msk.f32.mxu1 %vm181_vm0, %v174_v36 }
  0x2e   : > { %781 = vmatmul.mubr.msk.f32.gmra.mrb[14].mxu0 %vm181_vm0, %v159_v37 }
  0x30   : > { %805 = vmatmul.mubr.msk.f32.gmra.mrb[14].mxu1 %vm181_vm0, %v175_v38 }
  0xe5   : > { %v761_v39 = vpop.f32.mrb[0].mxu0 }
  0xe6   : > { %v545_v40 = vmul.f32 %v761_v39, %v761_v39  ;;  %v348_v41 = vpop.f32.mrb[1].mxu0 }
  0xe7   : > { %v507_v42 = vadd.f32 %v761_v39, %v348_v41  ;;  %v544_v43 = vmul.f32 %v348_v41, %v348_v41  ;;  %v947_v44 = vpop.f32.mrb[0].mxu1 }
  0xe8   : > { %v949_v45 = vpop.f32.mrb[1].mxu1 }
  0xe9   : > { %v576_v46 = vadd.f32 %v545_v40, %v544_v43  ;;  %v764_v47 = vpop.f32.mrb[2].mxu0 }
  0xea   : > { %v358_v48 = vpop.f32.mrb[3].mxu0  ;;  %v547_v53 = vmul.f32 %v764_v47, %v764_v47 }
  0xeb   : > { %v508_v49 = vadd.f32 %v507_v42, %v358_v48  ;;  %v546_v50 = vmul.f32 %v358_v48, %v358_v48  ;;  %v951_v51 = vpop.f32.mrb[2].mxu1 }
  0xec   : > { %v953_v52 = vpop.f32.mrb[3].mxu1 }
  0xed   : > { %v577_v54 = vadd.f32 %v576_v46, %v546_v50  ;;  %v767_v55 = vpop.f32.mrb[4].mxu0  ;;  %v509_v56 = vadd.f32 %v764_v47, %v508_v49 }
  0xee   : > { %v368_v57 = vpop.f32.mrb[5].mxu0  ;;  %v549_v63 = vmul.f32 %v767_v55, %v767_v55 }
  0xef   : > { %v510_v58 = vadd.f32 %v509_v56, %v368_v57  ;;  %v548_v59 = vmul.f32 %v368_v57, %v368_v57  ;;  %v578_v60 = vadd.f32 %v577_v54, %v547_v53  ;;  %v955_v61 = vpop.f32.mrb[4].mxu1  ;;  %v560_v56 = vmul.f32 %v949_v45, %v949_v45 }
  0xf0   : > { %v957_v62 = vpop.f32.mrb[5].mxu1 }
  0xf1   : > { %v579_v0 = vadd.f32 %v578_v60, %v548_v59  ;;  %v770_v1 = vpop.f32.mrb[6].mxu0  ;;  %v511_v2 = vadd.f32 %v767_v55, %v510_v58  ;;  %v561_v59 = vmul.f32 %v947_v44, %v947_v44 }
  0xf2   : > { %v378_v3 = vpop.f32.mrb[7].mxu0  ;;  %v551_v9 = vmul.f32 %v770_v1, %v770_v1 }
  0xf3   : > { %v512_v4 = vadd.f32 %v511_v2, %v378_v3  ;;  %v550_v5 = vmul.f32 %v378_v3, %v378_v3  ;;  %v580_v6 = vadd.f32 %v579_v0, %v549_v63  ;;  %v959_v7 = vpop.f32.mrb[6].mxu1  ;;  %v562_v0 = vmul.f32 %v953_v52, %v953_v52 }
  0xf4   : > { %v961_v8 = vpop.f32.mrb[7].mxu1  ;;  %v563_v3 = vmul.f32 %v951_v51, %v951_v51 }
  0xf5   : > { %v581_v10 = vadd.f32 %v580_v6, %v550_v5  ;;  %v773_v11 = vpop.f32.mrb[8].mxu0  ;;  %v513_v12 = vadd.f32 %v770_v1, %v512_v4 }
  0xf6   : > { %v388_v13 = vpop.f32.mrb[9].mxu0  ;;  %v553_v19 = vmul.f32 %v773_v11, %v773_v11 }
  0xf7   : > { %v514_v14 = vadd.f32 %v513_v12, %v388_v13  ;;  %v552_v15 = vmul.f32 %v388_v13, %v388_v13  ;;  %v582_v16 = vadd.f32 %v581_v10, %v551_v9  ;;  %v963_v17 = vpop.f32.mrb[8].mxu1 }
  0xf8   : > { %v468_v18 = vpop.f32.mrb[9].mxu1 }
  0xf9   : > { %v583_v20 = vadd.f32 %v582_v16, %v552_v15  ;;  %v776_v21 = vpop.f32.mrb[10].mxu0  ;;  %v515_v22 = vadd.f32 %v773_v11, %v514_v14 }
  0xfa   : > { %v398_v23 = vpop.f32.mrb[11].mxu0  ;;  %v555_v29 = vmul.f32 %v776_v21, %v776_v21 }
  0xfb   : > { %v516_v24 = vadd.f32 %v515_v22, %v398_v23  ;;  %v554_v25 = vmul.f32 %v398_v23, %v398_v23  ;;  %v584_v26 = vadd.f32 %v583_v20, %v553_v19  ;;  %v800_v27 = vpop.f32.mrb[10].mxu1  ;;  %v569_v20 = vmul.f32 %v963_v17, %v963_v17 }
  0xfc   : > { %v478_v28 = vpop.f32.mrb[11].mxu1 }
  0xfd   : > { %v585_v30 = vadd.f32 %v584_v26, %v554_v25  ;;  %v779_v31 = vpop.f32.mrb[12].mxu0  ;;  %v517_v32 = vadd.f32 %v776_v21, %v516_v24  ;;  %v570_v22 = vmul.f32 %v478_v28, %v478_v28 }
  0xfe   : > { %v408_v33 = vpop.f32.mrb[13].mxu0  ;;  %v557_v39 = vmul.f32 %v779_v31, %v779_v31 }
  0xff   : > { %v518_v34 = vadd.f32 %v517_v32, %v408_v33  ;;  %v556_v35 = vmul.f32 %v408_v33, %v408_v33  ;;  %v586_v36 = vadd.f32 %v585_v30, %v555_v29  ;;  %v803_v37 = vpop.f32.mrb[12].mxu1 }
 0x100   : > { %v488_v38 = vpop.f32.mrb[13].mxu1 }
 0x101   : > { %v587_v40 = vadd.f32 %v586_v36, %v556_v35  ;;  %v782_v41 = vpop.f32.mrb[14].mxu0  ;;  %v519_v42 = vadd.f32 %v779_v31, %v518_v34  ;;  %v572_v29 = vmul.f32 %v488_v38, %v488_v38 }
 0x102   : > { %v418_v43 = vpop.f32.mrb[15].mxu0  ;;  %v559_v53 = vmul.f32 %v782_v41, %v782_v41 }
 0x103   : > { %v520_v46 = vadd.f32 %v519_v42, %v418_v43  ;;  %v558_v47 = vmul.f32 %v418_v43, %v418_v43  ;;  %v588_v48 = vadd.f32 %v587_v40, %v557_v39  ;;  %v806_v49 = vpop.f32.mrb[14].mxu1 }
 0x104   : > { %v498_v50 = vpop.f32.mrb[15].mxu1  ;;  %v575_v36 = vmul.f32 %v806_v49, %v806_v49 }
 0x105   : > { %v521_v54 = vadd.f32 %v782_v41, %v520_v46  ;;  %v589_v55 = vadd.f32 %v588_v48, %v558_v47  ;;  %v574_v33 = vmul.f32 %v498_v50, %v498_v50 }
 0x107   : > { %v590_v57 = vadd.f32 %v589_v55, %v559_v53  ;;  %v522_v58 = vadd.f32 %v521_v54, %v949_v45  ;;  %v564_v45 = vmul.f32 %v957_v62, %v957_v62 }
 0x109   : > { %v591_v60 = vadd.f32 %v590_v57, %v560_v56  ;;  %v523_v63 = vadd.f32 %v947_v44, %v522_v58  ;;  %v565_v44 = vmul.f32 %v955_v61, %v955_v61 }
 0x10b   : > { %v524_v1 = vadd.f32 %v523_v63, %v953_v52  ;;  %v592_v2 = vadd.f32 %v591_v60, %v561_v59  ;;  %v566_v52 = vmul.f32 %v961_v8, %v961_v8 }
 0x10d   : > { %v593_v4 = vadd.f32 %v592_v2, %v562_v0  ;;  %v525_v5 = vadd.f32 %v951_v51, %v524_v1  ;;  %v567_v51 = vmul.f32 %v959_v7, %v959_v7 }
 0x10f   : > { %v526_v6 = vadd.f32 %v525_v5, %v957_v62  ;;  %v594_v9 = vadd.f32 %v593_v4, %v563_v3  ;;  %v568_v62 = vmul.f32 %v468_v18, %v468_v18 }
 0x111   : > { %v595_v10 = vadd.f32 %v594_v9, %v564_v45  ;;  %v527_v11 = vadd.f32 %v955_v61, %v526_v6 }
 0x113   : > { %v528_v12 = vadd.f32 %v527_v11, %v961_v8  ;;  %v596_v13 = vadd.f32 %v595_v10, %v565_v44  ;;  %v571_v8 = vmul.f32 %v800_v27, %v800_v27 }
 0x115   : > { %v597_v14 = vadd.f32 %v596_v13, %v566_v52  ;;  %v529_v15 = vadd.f32 %v959_v7, %v528_v12  ;;  %v573_v7 = vmul.f32 %v803_v37, %v803_v37 }
 0x117   : > { %v530_v16 = vadd.f32 %v529_v15, %v468_v18  ;;  %v598_v19 = vadd.f32 %v597_v14, %v567_v51 }
 0x119   : > { %v599_v21 = vadd.f32 %v598_v19, %v568_v62  ;;  %v531_v61 = vadd.f32 %v963_v17, %v530_v16 }
 0x11b   : > { %v532_v23 = vadd.f32 %v531_v61, %v478_v28  ;;  %v600_v24 = vadd.f32 %v599_v21, %v569_v20 }
 0x11d   : > { %v601_v25 = vadd.f32 %v600_v24, %v570_v22  ;;  %v533_v26 = vadd.f32 %v800_v27, %v532_v23 }
 0x11f   : > { %v534_v30 = vadd.f32 %v533_v26, %v488_v38  ;;  %v602_v31 = vadd.f32 %v601_v25, %v571_v8 }
 0x121   : > { %v603_v18 = vadd.f32 %v602_v31, %v572_v29  ;;  %v535_v32 = vadd.f32 %v803_v37, %v534_v30 }
 0x123   : > { %v536_v34 = vadd.f32 %v535_v32, %v498_v50  ;;  %v604_v35 = vadd.f32 %v603_v18, %v573_v7 }
 0x125   : > { %v537_v39 = vadd.f32 %v806_v49, %v536_v34  ;;  %v605_v17 = vadd.f32 %v604_v35, %v574_v33 }
 0x127   : > { %v538_v40 = vrot.slane %v537_v39, 4  ;;  %v606_v28 = vadd.f32 %v605_v17, %v575_v36 }
 0x129   : > { %v539_v41 = vadd.f32 %v538_v40, %v537_v39  ;;  %v607_v42 = vrot.slane %v606_v28, 4 }
 0x12b   : > { %v540_v43 = vrot.slane %v539_v41, 2  ;;  %v608_v27 = vadd.f32 %v607_v42, %v606_v28 }
 0x12d   : > { %v541_v38 = vadd.f32 %v540_v43, %v539_v41  ;;  %v609_v46 = vrot.slane %v608_v27, 2 }
 0x12f   : > { %v542_v47 = vrot.slane %v541_v38, 1  ;;  %v610_v48 = vadd.f32 %v609_v46, %v608_v27 }
 0x131   : > { %v611_v37 = vrot.slane %v610_v48, 1  ;;  %v543_v49 = vadd.f32 %v542_v47, %v541_v38 }
 0x133   : > { %v612_v50 = vadd.f32 %v611_v37, %v610_v48 }
 0x135   : > { %v614_v53 = vsel %vm613_vm2, %v543_v49, %v612_v50 }
 0x136   : > { %615 = vst [vmem:[%s143_s29] sm:$0x3] %v614_v53 }
 0x137 PF: > { %s12_s9 = sadd.s32 1, %s835_s9  }
 0x138   : > { %p9_p5 = scmp.ge.s32.totalorder %s12_s9, 4  }
 0x13a   :  { %11 = sbr.rel (!%p9_p5) target bundleno = 1 (0x1), region = 58 }

</bundles_post_ra>
